<compile_context>
chip_gen: v7x
topology: tpu7x:2x2x1
jax: 0.10.0
libtpu: 0.0.40
codegen_flags: <defaults>
</compile_context>

<pallas_src>
import jax
import jax.numpy as jnp
from jax.experimental import pallas as pl
from jax.experimental.pallas import tpu as pltpu


# ----------------------------- Pallas kernel ------------------------------ #
def cdae_kernel(
    x_ref,       # (TB, n_items_p)     int8  binary interaction vector (`input`)
    y_ref,       # (TB, n_items_p)     int8  binary reconstruction target (`output`)
    uemb_ref,    # (TB, dfac_p)        bf16  gathered user embeddings
    ew_ref,      # (n_items_p, dfac_p) bf16  encoder weight (pre-transposed)
    eb_ref,      # (1, dfac_p)         f32   encoder bias
    dw_ref,      # (dfac_p, n_items_p) bf16  decoder weight (pre-transposed)
    db_ref,      # (1, n_items_p)      f32   decoder bias (padded cols hold -100)
    p1w_ref,     # (dfac_p, proj_p)    bf16  proj_head[0] weight
    p1b_ref,     # (1, proj_p)         f32
    p2w_ref,     # (proj_p, proj_p)    bf16  proj_head[2] weight
    p2b_ref,     # (1, proj_p)         f32
    probs_ref,   # out (TB, n_items_p) bf16  sigmoid(decoder(h))
    psum_ref,    # out (TB, 1)         f32   per-sample BCE sums
    zproj_ref,   # out (TB, proj_p)    f32
):
    f32, bf16 = jnp.float32, jnp.bfloat16

    # ---- encoder: h = x @ We + be + u_emb  (dropout: eval -> identity) ----
    x = x_ref[...].astype(bf16)                       # int8 -> bf16 MXU operand
    h = jnp.dot(x, ew_ref[...], preferred_element_type=f32)
    h = h + eb_ref[...] + uemb_ref[...].astype(f32)
    h_lo = h.astype(bf16)                             # bf16 operand for the MXU

    # ---- decoder pre-activation.  Padded item columns carry db = -100, so both
    # the sigmoid and the BCE underflow to ~0 there — no per-element mask. ----
    z = jnp.dot(h_lo, dw_ref[...], preferred_element_type=f32) + db_ref[...]

    # ---- fused sigmoid + BCE: one exp shared by both, all f32 VPU/EUP work ----
    e = jnp.exp(-jnp.abs(z))
    inv = pl.reciprocal(1.0 + e, approx=True)
    # approx reciprocal may overshoot by ~2^-12; the bf16 store rounds that back
    # to exactly <= 1.0, so no probability above one ever leaves the kernel.
    probs_ref[...] = (jnp.where(z >= 0, 1.0, e) * inv).astype(probs_ref.dtype)

    y = y_ref[...].astype(f32)
    # Stable logits-form of BCE(sigmoid(z), y).  (PyTorch's -100 log clamp only
    # differs for |z| > 100, which never occurs for finite-scale weights.)
    bce = jnp.maximum(z, 0.0) - y * z + jnp.log(1.0 + e)
    psum_ref[...] = jnp.sum(bce, axis=1, keepdims=True)

    # ---- projection head: Linear -> ReLU -> Linear ----
    z1 = jnp.dot(h_lo, p1w_ref[...], preferred_element_type=f32) + p1b_ref[...]
    z1 = jnp.maximum(z1, 0.0)
    z2 = jnp.dot(z1.astype(bf16), p2w_ref[...],
                 preferred_element_type=f32) + p2b_ref[...]
    zproj_ref[...] = z2


# ------------------------------- Wrapper ----------------------------------- #
_ROW_ALIGN = 32          # int8 inputs pack 32 rows per (32, 128) sublane tile


def _round_up(v, m):
    return ((v + m - 1) // m) * m


def _pad2(a, rows, cols, dtype, fill=0):
    a = jnp.pad(a, ((0, rows - a.shape[0]), (0, cols - a.shape[1])),
                constant_values=fill)
    return a.astype(dtype)


def _choose_tiling(B, n_items_p, dfac_p, proj_p):
    """Pick batch-tile size and VMEM limit from the actual footprint.

    Conservative: resident (constant-index) weight blocks are counted as if the
    pipeline double-buffers them, so the choice is safe either way.
    """
    try:
        info = pltpu.get_tpu_info()
        vmem_cap = int(getattr(info, "vmem_capacity_bytes", 64 << 20))
    except Exception:                      # no/odd TPU info -> be conservative
        vmem_cap = 64 << 20                # v7x has the smallest VMEM per TC
    small_vmem = vmem_cap <= (64 << 20)    # v7x: 64 MiB/TC; v5e/v6e: 128 MiB
    vmem_limit = (48 << 20) if small_vmem else (100 << 20)
    tb_cap = 256 if small_vmem else 512
    budget = int(vmem_limit * 0.85)        # headroom for Mosaic internal scratch

    # Resident weights/biases, counted twice (worst case: double-buffered).
    w_bytes = 2 * (2 * (2 * n_items_p * dfac_p + dfac_p * proj_p + proj_p * proj_p)
                   + 4 * (dfac_p + n_items_p + 2 * proj_p))
    # Streamed bytes per batch row (x2 double buffering):
    #   x, y int8; probs bf16; u_emb bf16; z_proj f32; per-sample sum f32.
    stream_row = 2 * (4 * n_items_p + 2 * dfac_p + 4 * proj_p + 4)
    # Rough bound on live f32 intermediates per row (z/e/bce chain, h, z1/z2).
    interm_row = 4 * (3 * n_items_p + 2 * dfac_p + 3 * proj_p)
    per_row = stream_row + interm_row

    # If even the minimum tile does not fit (huge vocab), fall back to the
    # minimum anyway — scaling past that needs an item-column grid axis.
    avail = max(budget - w_bytes, _ROW_ALIGN * per_row)
    tb = max(_ROW_ALIGN, (avail // per_row) // _ROW_ALIGN * _ROW_ALIGN)
    tb = min(tb, tb_cap)
    # Keep at least two grid steps when the batch allows it so the "parallel"
    # batch axis can shard across v7x's two TensorCores.
    if B > _ROW_ALIGN:
        tb = min(tb, _round_up(-(-B // 2), _ROW_ALIGN))
    tb = min(tb, _round_up(B, _ROW_ALIGN))
    return tb, vmem_limit


@jax.jit
def cdae_forward(user_id, x, y, params):
    """Pallas-backed CDAE.forward(user_id, input, output, is_train=False).

    Returns (probs, recon_loss, z_proj).  `probs` are the post-sigmoid
    probabilities (the PyTorch module calls them `logits`), emitted in bf16.
    """
    B, n_items = x.shape
    dfac = params["enc_w"].shape[1]
    proj_hid = params["p2_w"].shape[1]

    # Lane-dense padding (multiples of 128) + footprint-sized batch tile.
    n_items_p = _round_up(n_items, 128)
    dfac_p = _round_up(dfac, 128)
    proj_p = _round_up(proj_hid, 128)
    tb, vmem_limit = _choose_tiling(B, n_items_p, dfac_p, proj_p)
    b_p = _round_up(B, tb)
    grid = b_p // tb

    i8, bf16, f32 = jnp.int8, jnp.bfloat16, jnp.float32

    # Embedding lookup (gather) is glue — done in plain JAX / XLA.
    u_emb = params["user_emb"][user_id]                        # (B, dfac) f32

    # x / y are binary implicit-feedback vectors: int8 halves their HBM bytes;
    # the kernel up-casts to bf16 / f32 on the VPU (sits in slack).
    x_p = _pad2(x, b_p, n_items_p, i8)
    y_p = _pad2(y, b_p, n_items_p, i8)
    u_p = _pad2(u_emb, b_p, dfac_p, bf16)
    ew = _pad2(params["enc_w"], n_items_p, dfac_p, bf16)
    eb = _pad2(params["enc_b"], 1, dfac_p, f32)
    dw = _pad2(params["dec_w"], dfac_p, n_items_p, bf16)
    # Finite -100 in padded decoder-bias columns (NOT -inf: y*z would be NaN);
    # sigmoid/BCE underflow to ~0 there so the kernel needs no column mask.
    db = _pad2(params["dec_b"], 1, n_items_p, f32, fill=-100.0)
    p1w = _pad2(params["p1_w"], dfac_p, proj_p, bf16)
    p1b = _pad2(params["p1_b"], 1, proj_p, f32)
    p2w = _pad2(params["p2_w"], proj_p, proj_p, bf16)
    p2b = _pad2(params["p2_b"], 1, proj_p, f32)

    batch_tile = lambda cols: pl.BlockSpec((tb, cols), lambda i: (i, 0))
    resident = lambda r, c: pl.BlockSpec((r, c), lambda i: (0, 0))

    probs_p, psum_p, zproj_p = pl.pallas_call(
        cdae_kernel,
        out_shape=(
            jax.ShapeDtypeStruct((b_p, n_items_p), bf16),   # probs (bf16 stream)
            jax.ShapeDtypeStruct((b_p, 1), f32),            # per-sample BCE sums
            jax.ShapeDtypeStruct((b_p, proj_p), f32),       # z_proj (tiny, keep f32)
        ),
        grid_spec=pltpu.PrefetchScalarGridSpec(
            num_scalar_prefetch=0,
            grid=(grid,),
            in_specs=[
                batch_tile(n_items_p),           # x  (int8)
                batch_tile(n_items_p),           # y  (int8)
                batch_tile(dfac_p),              # u_emb (bf16)
                resident(n_items_p, dfac_p),     # enc_w (resident in VMEM)
                resident(1, dfac_p),             # enc_b
                resident(dfac_p, n_items_p),     # dec_w (resident in VMEM)
                resident(1, n_items_p),          # dec_b
                resident(dfac_p, proj_p),        # p1_w
                resident(1, proj_p),             # p1_b
                resident(proj_p, proj_p),        # p2_w
                resident(1, proj_p),             # p2_b
            ],
            out_specs=(
                batch_tile(n_items_p),           # probs
                batch_tile(1),                   # per-sample BCE sums
                batch_tile(proj_p),              # z_proj
            ),
        ),
        compiler_params=pltpu.CompilerParams(
            dimension_semantics=("parallel",),   # batch tiles are independent
            vmem_limit_bytes=vmem_limit,         # sized per generation above
        ),
    )(x_p, y_p, u_p, ew, eb, dw, db, p1w, p1b, p2w, p2b)

    probs = probs_p[:B, :n_items]
    recon_loss = jnp.sum(psum_p[:B, 0]) / B      # mean over the true batch only
    z_proj = zproj_p[:B, :proj_hid]
    return probs, recon_loss, z_proj


# --------------------------- Parameter creation ----------------------------- #
def init_params(key, n_users, n_items, dfac, proj_hid):
    """Deterministic synthetic init mirroring CDAE.init_weight shapes."""
    ks = jax.random.split(key, 8)

    def xavier(k, fan_in, fan_out):
        limit = (6.0 / (fan_in + fan_out)) ** 0.5
        # stored already transposed: (fan_in, fan_out) so the kernel computes x @ W
        return jax.random.uniform(
            k, (fan_in, fan_out), jnp.float32, minval=-limit, maxval=limit
        )

    def small_bias(k, n):
        # trunc_normal(std=0.001) approximation
        return jnp.clip(0.001 * jax.random.normal(k, (1, n), jnp.float32), -0.002, 0.002)

    return {
        "user_emb": jax.random.normal(ks[0], (n_users, dfac), jnp.float32),
        "enc_w": xavier(ks[1], n_items, dfac),
        "enc_b": small_bias(ks[2], dfac),
        "dec_w": xavier(ks[3], dfac, n_items),
        "dec_b": small_bias(ks[4], n_items),
        "p1_w": xavier(ks[5], dfac, proj_hid),
        "p1_b": jnp.zeros((1, proj_hid), jnp.float32),
        "p2_w": xavier(ks[6], proj_hid, proj_hid),
        "p2_b": jnp.zeros((1, proj_hid), jnp.float32),
    }


# ---------------------------------- Main ------------------------------------ #
if __name__ == "__main__":
    # Small shapes consistent with the module.  n_items is deliberately not a
    # multiple of 128 and dfac/proj_hid are 64, so every padding path in the
    # kernel (item columns, dfac/proj lanes, batch rows) is exercised.
    B, n_users, n_items, dfac, proj_hid = 8, 16, 200, 64, 64

    key = jax.random.PRNGKey(0)
    k_par, k_uid, k_x, k_y = jax.random.split(key, 4)
    params = init_params(k_par, n_users, n_items, dfac, proj_hid)

    user_id = jax.random.randint(k_uid, (B,), 0, n_users)
    x = (jax.random.uniform(k_x, (B, n_items)) < 0.1).astype(jnp.float32)
    y = (jax.random.uniform(k_y, (B, n_items)) < 0.1).astype(jnp.float32)

    probs, recon_loss, z_proj = cdae_forward(user_id, x, y, params)
    jax.block_until_ready((probs, recon_loss, z_proj))

    assert probs.shape == (B, n_items)
    assert recon_loss.shape == ()
    assert z_proj.shape == (B, proj_hid)
    assert bool(jnp.isfinite(recon_loss))
    assert bool(jnp.all(probs <= 1.0)) and bool(jnp.all(probs >= 0.0))

    # Pure-JAX reference using the same bf16 rounding of the MXU operands /
    # streamed embeddings.
    def reference(uid, xx, yy, p):
        bf = lambda a: a.astype(jnp.bfloat16).astype(jnp.float32)
        h = bf(xx) @ bf(p["enc_w"]) + p["enc_b"] + bf(p["user_emb"][uid])
        z = bf(h) @ bf(p["dec_w"]) + p["dec_b"]
        pr = jax.nn.sigmoid(z)
        bce = jnp.maximum(z, 0.0) - yy * z + jnp.log1p(jnp.exp(-jnp.abs(z)))
        loss = jnp.mean(jnp.sum(bce, axis=1))
        z1 = jnp.maximum(bf(h) @ bf(p["p1_w"]) + p["p1_b"], 0.0)
        z2 = bf(z1) @ bf(p["p2_w"]) + p["p2_b"]
        return pr, loss, z2

    ref_probs, ref_loss, ref_zproj = reference(user_id, x, y, params)
    assert bool(jnp.allclose(probs.astype(jnp.float32), ref_probs,
                             rtol=1e-2, atol=1e-2))
    assert bool(jnp.allclose(recon_loss, ref_loss, rtol=1e-2, atol=1e-2))
    assert bool(jnp.allclose(z_proj, ref_zproj, rtol=1e-2, atol=1e-2))

    print("KERNEL_OK")
</pallas_src>

<mosaic_0001>
module attributes {stable_mosaic.version = 11 : i64} {
  func.func @cdae_kernel(%arg0: i32, %arg1: memref<32x256xi8, #tpu.memory_space<vmem>>, %arg2: memref<32x256xi8, #tpu.memory_space<vmem>>, %arg3: memref<32x128xbf16, #tpu.memory_space<vmem>>, %arg4: memref<256x128xbf16, #tpu.memory_space<vmem>>, %arg5: memref<1x128xf32, #tpu.memory_space<vmem>>, %arg6: memref<128x256xbf16, #tpu.memory_space<vmem>>, %arg7: memref<1x256xf32, #tpu.memory_space<vmem>>, %arg8: memref<128x128xbf16, #tpu.memory_space<vmem>>, %arg9: memref<1x128xf32, #tpu.memory_space<vmem>>, %arg10: memref<128x128xbf16, #tpu.memory_space<vmem>>, %arg11: memref<1x128xf32, #tpu.memory_space<vmem>>, %arg12: memref<32x256xbf16, #tpu.memory_space<vmem>>, %arg13: memref<32x1xf32, #tpu.memory_space<vmem>>, %arg14: memref<32x128xf32, #tpu.memory_space<vmem>>) attributes {dimension_semantics = [#tpu.dimension_semantics<parallel>], iteration_bounds = array<i64: 1>, scalar_prefetch = 0 : i64, scratch_operands = 0 : i64, tpu.core_type = #tpu.core_type<tc>, window_params = [{transform_indices = @transform_0, window_bounds = array<i64: 32, 256>}, {transform_indices = @transform_1, window_bounds = array<i64: 32, 256>}, {transform_indices = @transform_2, window_bounds = array<i64: 32, 128>}, {pipeline_mode = #tpu.pipeline_mode<synchronous>, transform_indices = @transform_3, window_bounds = array<i64: 256, 128>}, {pipeline_mode = #tpu.pipeline_mode<synchronous>, transform_indices = @transform_4, window_bounds = array<i64: 1, 128>}, {pipeline_mode = #tpu.pipeline_mode<synchronous>, transform_indices = @transform_5, window_bounds = array<i64: 128, 256>}, {pipeline_mode = #tpu.pipeline_mode<synchronous>, transform_indices = @transform_6, window_bounds = array<i64: 1, 256>}, {pipeline_mode = #tpu.pipeline_mode<synchronous>, transform_indices = @transform_7, window_bounds = array<i64: 128, 128>}, {pipeline_mode = #tpu.pipeline_mode<synchronous>, transform_indices = @transform_8, window_bounds = array<i64: 1, 128>}, {pipeline_mode = #tpu.pipeline_mode<synchronous>, transform_indices = @transform_9, window_bounds = array<i64: 128, 128>}, {pipeline_mode = #tpu.pipeline_mode<synchronous>, transform_indices = @transform_10, window_bounds = array<i64: 1, 128>}, {transform_indices = @transform_11, window_bounds = array<i64: 32, 256>}, {transform_indices = @transform_12, window_bounds = array<i64: 32, 1>}, {transform_indices = @transform_13, window_bounds = array<i64: 32, 128>}]} {
    %c0 = arith.constant 0 : index
    %c0_0 = arith.constant 0 : index
    %0 = vector.load %arg1[%c0, %c0_0] : memref<32x256xi8, #tpu.memory_space<vmem>>, vector<32x256xi8>
    %1 = arith.sitofp %0 : vector<32x256xi8> to vector<32x256xbf16>
    %c0_1 = arith.constant 0 : index
    %c0_2 = arith.constant 0 : index
    %2 = vector.load %arg4[%c0_1, %c0_2] : memref<256x128xbf16, #tpu.memory_space<vmem>>, vector<256x128xbf16>
    %cst = arith.constant dense<0.000000e+00> : vector<32x128xf32>
    %3 = tpu.matmul %1, %2, %cst {dimension_numbers = #tpu.dot_dimension_numbers<[1], [0], [0], [1], [0, 0, 1, 1], [], []>} : vector<32x256xbf16>, vector<256x128xbf16>, vector<32x128xf32> -> vector<32x128xf32>
    %c0_3 = arith.constant 0 : index
    %c0_4 = arith.constant 0 : index
    %4 = vector.load %arg5[%c0_3, %c0_4] : memref<1x128xf32, #tpu.memory_space<vmem>>, vector<1x128xf32>
    %5 = vector.broadcast %4 : vector<1x128xf32> to vector<32x128xf32>
    %6 = arith.addf %3, %5 : vector<32x128xf32>
    %c0_5 = arith.constant 0 : index
    %c0_6 = arith.constant 0 : index
    %7 = vector.load %arg3[%c0_5, %c0_6] : memref<32x128xbf16, #tpu.memory_space<vmem>>, vector<32x128xbf16>
    %8 = arith.extf %7 : vector<32x128xbf16> to vector<32x128xf32>
    %9 = arith.addf %6, %8 : vector<32x128xf32>
    %10 = arith.truncf %9 : vector<32x128xf32> to vector<32x128xbf16>
    %c0_7 = arith.constant 0 : index
    %c0_8 = arith.constant 0 : index
    %11 = vector.load %arg6[%c0_7, %c0_8] : memref<128x256xbf16, #tpu.memory_space<vmem>>, vector<128x256xbf16>
    %cst_9 = arith.constant dense<0.000000e+00> : vector<32x256xf32>
    %12 = tpu.matmul %10, %11, %cst_9 {dimension_numbers = #tpu.dot_dimension_numbers<[1], [0], [0], [1], [0, 0, 1, 1], [], []>} : vector<32x128xbf16>, vector<128x256xbf16>, vector<32x256xf32> -> vector<32x256xf32>
    %c0_10 = arith.constant 0 : index
    %c0_11 = arith.constant 0 : index
    %13 = vector.load %arg7[%c0_10, %c0_11] : memref<1x256xf32, #tpu.memory_space<vmem>>, vector<1x256xf32>
    %14 = vector.broadcast %13 : vector<1x256xf32> to vector<32x256xf32>
    %15 = arith.addf %12, %14 : vector<32x256xf32>
    %16 = math.absf %15 : vector<32x256xf32>
    %cst_12 = arith.constant 0.000000e+00 : f32
    %17 = vector.broadcast %cst_12 : f32 to vector<32x256xf32>
    %18 = arith.subf %17, %16 : vector<32x256xf32>
    %19 = math.exp %18 : vector<32x256xf32>
    %cst_13 = arith.constant 1.000000e+00 : f32
    %20 = vector.broadcast %cst_13 : f32 to vector<32x256xf32>
    %21 = arith.addf %20, %19 : vector<32x256xf32>
    %22 = tpu.reciprocal %21 {approx = true} : vector<32x256xf32> -> vector<32x256xf32>
    %cst_14 = arith.constant 0.000000e+00 : f32
    %23 = vector.broadcast %cst_14 : f32 to vector<32x256xf32>
    %24 = arith.cmpf oge, %15, %23 : vector<32x256xf32>
    %cst_15 = arith.constant 1.000000e+00 : f32
    %25 = vector.broadcast %cst_15 : f32 to vector<32x256xf32>
    %26 = arith.select %24, %25, %19 : vector<32x256xi1>, vector<32x256xf32>
    %27 = arith.mulf %26, %22 : vector<32x256xf32>
    %28 = arith.truncf %27 : vector<32x256xf32> to vector<32x256xbf16>
    %c0_16 = arith.constant 0 : index
    %c0_17 = arith.constant 0 : index
    %29 = vector.load %arg12[%c0_16, %c0_17] : memref<32x256xbf16, #tpu.memory_space<vmem>>, vector<32x256xbf16>
    tpu.vector_store %arg12[%c0_16, %c0_17], %28 {strides = array<i32>} : memref<32x256xbf16, #tpu.memory_space<vmem>>, vector<32x256xbf16>,
    %c0_18 = arith.constant 0 : index
    %c0_19 = arith.constant 0 : index
    %30 = vector.load %arg2[%c0_18, %c0_19] : memref<32x256xi8, #tpu.memory_space<vmem>>, vector<32x256xi8>
    %31 = arith.sitofp %30 : vector<32x256xi8> to vector<32x256xf32>
    %cst_20 = arith.constant 0.000000e+00 : f32
    %32 = vector.broadcast %cst_20 : f32 to vector<32x256xf32>
    %33 = arith.maximumf %15, %32 : vector<32x256xf32>
    %34 = arith.mulf %31, %15 : vector<32x256xf32>
    %35 = arith.subf %33, %34 : vector<32x256xf32>
    %cst_21 = arith.constant 1.000000e+00 : f32
    %36 = vector.broadcast %cst_21 : f32 to vector<32x256xf32>
    %37 = arith.addf %36, %19 : vector<32x256xf32>
    %38 = math.log %37 : vector<32x256xf32>
    %39 = arith.addf %35, %38 : vector<32x256xf32>
    %cst_22 = arith.constant dense<0.000000e+00> : vector<32xf32>
    %40 = vector.multi_reduction <add>, %39, %cst_22 [1] : vector<32x256xf32> to vector<32xf32>
    %41 = vector.shape_cast %40 : vector<32xf32> to vector<32x1xf32>
    %c0_23 = arith.constant 0 : index
    %c0_24 = arith.constant 0 : index
    %42 = vector.load %arg13[%c0_23, %c0_24] : memref<32x1xf32, #tpu.memory_space<vmem>>, vector<32x1xf32>
    tpu.vector_store %arg13[%c0_23, %c0_24], %41 {strides = array<i32>} : memref<32x1xf32, #tpu.memory_space<vmem>>, vector<32x1xf32>,
    %c0_25 = arith.constant 0 : index
    %c0_26 = arith.constant 0 : index
    %43 = vector.load %arg8[%c0_25, %c0_26] : memref<128x128xbf16, #tpu.memory_space<vmem>>, vector<128x128xbf16>
    %cst_27 = arith.constant dense<0.000000e+00> : vector<32x128xf32>
    %44 = tpu.matmul %10, %43, %cst_27 {dimension_numbers = #tpu.dot_dimension_numbers<[1], [0], [0], [1], [0, 0, 1, 1], [], []>} : vector<32x128xbf16>, vector<128x128xbf16>, vector<32x128xf32> -> vector<32x128xf32>
    %c0_28 = arith.constant 0 : index
    %c0_29 = arith.constant 0 : index
    %45 = vector.load %arg9[%c0_28, %c0_29] : memref<1x128xf32, #tpu.memory_space<vmem>>, vector<1x128xf32>
    %46 = vector.broadcast %45 : vector<1x128xf32> to vector<32x128xf32>
    %47 = arith.addf %44, %46 : vector<32x128xf32>
    %cst_30 = arith.constant 0.000000e+00 : f32
    %48 = vector.broadcast %cst_30 : f32 to vector<32x128xf32>
    %49 = arith.maximumf %47, %48 : vector<32x128xf32>
    %50 = arith.truncf %49 : vector<32x128xf32> to vector<32x128xbf16>
    %c0_31 = arith.constant 0 : index
    %c0_32 = arith.constant 0 : index
    %51 = vector.load %arg10[%c0_31, %c0_32] : memref<128x128xbf16, #tpu.memory_space<vmem>>, vector<128x128xbf16>
    %cst_33 = arith.constant dense<0.000000e+00> : vector<32x128xf32>
    %52 = tpu.matmul %50, %51, %cst_33 {dimension_numbers = #tpu.dot_dimension_numbers<[1], [0], [0], [1], [0, 0, 1, 1], [], []>} : vector<32x128xbf16>, vector<128x128xbf16>, vector<32x128xf32> -> vector<32x128xf32>
    %c0_34 = arith.constant 0 : index
    %c0_35 = arith.constant 0 : index
    %53 = vector.load %arg11[%c0_34, %c0_35] : memref<1x128xf32, #tpu.memory_space<vmem>>, vector<1x128xf32>
    %54 = vector.broadcast %53 : vector<1x128xf32> to vector<32x128xf32>
    %55 = arith.addf %52, %54 : vector<32x128xf32>
    %c0_36 = arith.constant 0 : index
    %c0_37 = arith.constant 0 : index
    %56 = vector.load %arg14[%c0_36, %c0_37] : memref<32x128xf32, #tpu.memory_space<vmem>>, vector<32x128xf32>
    tpu.vector_store %arg14[%c0_36, %c0_37], %55 {strides = array<i32>} : memref<32x128xf32, #tpu.memory_space<vmem>>, vector<32x128xf32>,
    return
  }
  func.func @transform_0(%arg0: i32) -> (i32, i32) {
    %c0_i32 = arith.constant 0 : i32
    %c0_i32_0 = arith.constant 0 : i32
    return %arg0, %c0_i32 : i32, i32
  }
  func.func @transform_1(%arg0: i32) -> (i32, i32) {
    %c0_i32 = arith.constant 0 : i32
    %c0_i32_0 = arith.constant 0 : i32
    return %arg0, %c0_i32 : i32, i32
  }
  func.func @transform_2(%arg0: i32) -> (i32, i32) {
    %c0_i32 = arith.constant 0 : i32
    %c0_i32_0 = arith.constant 0 : i32
    return %arg0, %c0_i32 : i32, i32
  }
  func.func @transform_3(%arg0: i32) -> (i32, i32) {
    %c0_i32 = arith.constant 0 : i32
    %c0_i32_0 = arith.constant 0 : i32
    %c0_i32_1 = arith.constant 0 : i32
    return %c0_i32, %c0_i32_0 : i32, i32
  }
  func.func @transform_4(%arg0: i32) -> (i32, i32) {
    %c0_i32 = arith.constant 0 : i32
    %c0_i32_0 = arith.constant 0 : i32
    %c0_i32_1 = arith.constant 0 : i32
    return %c0_i32, %c0_i32_0 : i32, i32
  }
  func.func @transform_5(%arg0: i32) -> (i32, i32) {
    %c0_i32 = arith.constant 0 : i32
    %c0_i32_0 = arith.constant 0 : i32
    %c0_i32_1 = arith.constant 0 : i32
    return %c0_i32, %c0_i32_0 : i32, i32
  }
  func.func @transform_6(%arg0: i32) -> (i32, i32) {
    %c0_i32 = arith.constant 0 : i32
    %c0_i32_0 = arith.constant 0 : i32
    %c0_i32_1 = arith.constant 0 : i32
    return %c0_i32, %c0_i32_0 : i32, i32
  }
  func.func @transform_7(%arg0: i32) -> (i32, i32) {
    %c0_i32 = arith.constant 0 : i32
    %c0_i32_0 = arith.constant 0 : i32
    %c0_i32_1 = arith.constant 0 : i32
    return %c0_i32, %c0_i32_0 : i32, i32
  }
  func.func @transform_8(%arg0: i32) -> (i32, i32) {
    %c0_i32 = arith.constant 0 : i32
    %c0_i32_0 = arith.constant 0 : i32
    %c0_i32_1 = arith.constant 0 : i32
    return %c0_i32, %c0_i32_0 : i32, i32
  }
  func.func @transform_9(%arg0: i32) -> (i32, i32) {
    %c0_i32 = arith.constant 0 : i32
    %c0_i32_0 = arith.constant 0 : i32
    %c0_i32_1 = arith.constant 0 : i32
    return %c0_i32, %c0_i32_0 : i32, i32
  }
  func.func @transform_10(%arg0: i32) -> (i32, i32) {
    %c0_i32 = arith.constant 0 : i32
    %c0_i32_0 = arith.constant 0 : i32
    %c0_i32_1 = arith.constant 0 : i32
    return %c0_i32, %c0_i32_0 : i32, i32
  }
  func.func @transform_11(%arg0: i32) -> (i32, i32) {
    %c0_i32 = arith.constant 0 : i32
    %c0_i32_0 = arith.constant 0 : i32
    return %arg0, %c0_i32 : i32, i32
  }
  func.func @transform_12(%arg0: i32) -> (i32, i32) {
    %c0_i32 = arith.constant 0 : i32
    %c0_i32_0 = arith.constant 0 : i32
    return %arg0, %c0_i32 : i32, i32
  }
  func.func @transform_13(%arg0: i32) -> (i32, i32) {
    %c0_i32 = arith.constant 0 : i32
    %c0_i32_0 = arith.constant 0 : i32
    return %arg0, %c0_i32 : i32, i32
  }
}

</mosaic_0001>

<bundles_post_ra>
// kernel: cdae_forward.1
= control target key start
LH: loop header
LB: loop body
LE: loop exit
PB: predicated region body
PF: predicated region fallthrough
CT: control target
= control target key end

     0   :  { %v1113_v45 = vmov 0   ;;  %vm585_vm8 = vcmask 7168   ;;  %s1492_s3 = inlined_call_operand.vmem [shape: bf16[256,128], index: 3, kind: input, shape index: {}]   ;;  %s1493_s0 = inlined_call_operand.vmem [shape: s8[32,256], index: 0, kind: input, shape index: {}]   ;;  %s1494_s5 = inlined_call_operand.vmem [shape: bf16[128,256], index: 5, kind: input, shape index: {}]   ;;  %s1495_s7 = inlined_call_operand.vmem [shape: bf16[128,128], index: 7, kind: input, shape index: {}]   ;;  %s1496_s9 = inlined_call_operand.vmem [shape: bf16[128,128], index: 9, kind: input, shape index: {}]   ;;  %s1497_s2 = inlined_call_operand.vmem [shape: bf16[32,128], index: 2, kind: input, shape index: {}]   ;;  %s1498_s4 = inlined_call_operand.vmem [shape: f32[1,128], index: 4, kind: input, shape index: {}]   ;;  %s1499_s6 = inlined_call_operand.vmem [shape: f32[1,256], index: 6, kind: input, shape index: {}]   ;;  %s1500_s8 = inlined_call_operand.vmem [shape: f32[1,128], index: 8, kind: input, shape index: {}]   ;;  %s1501_s1 = inlined_call_operand.vmem [shape: s8[32,256], index: 1, kind: input, shape index: {}]   ;;  %s1502_s11 = inlined_call_operand.vmem [shape: bf16[32,256], index: 11, kind: output, shape index: {0}]   ;;  %s1503_s12 = inlined_call_operand.vmem [shape: f32[32,1], index: 12, kind: output, shape index: {1}]   ;;  %s1504_s10 = inlined_call_operand.vmem [shape: f32[1,128], index: 10, kind: input, shape index: {}]   ;;  %s1505_s13 = inlined_call_operand.vmem [shape: f32[32,128], index: 13, kind: output, shape index: {2}]  }
   0x1   :  { %v1009_v0 = vld [vmem:[%s1492_s3 + $0x40] sm:$0xff]   ;;  %v1011_v2 = vld [vmem:[%s1492_s3 + $0x48] sm:$0xff]   ;;  %v1013_v4 = vld [vmem:[%s1492_s3 + $0x50] sm:$0xff]   ;;  %386 = vmatprep.mubr.bf16.mxu1 %v1113_v45 }
   0x2   :  { %v1010_v1 = vld [vmem:[%s1492_s3] sm:$0xff]   ;;  %920 = vmatprep.subr.bf16.mxu0 %v1009_v0  ;;  %v1012_v3 = vld [vmem:[%s1492_s3 + $0x8] sm:$0xff]   ;;  %v1014_v5 = vld [vmem:[%s1492_s3 + $0x10] sm:$0xff]  }
   0x3   :  { %921 = vmatpush3.bf16.msra.mxu0 %v1010_v1  ;;  %v1015_v6 = vld [vmem:[%s1492_s3 + $0x58] sm:$0xff]   ;;  %v1017_v8 = vld [vmem:[%s1492_s3 + $0x60] sm:$0xff]   ;;  %v1019_v10 = vld [vmem:[%s1492_s3 + $0x68] sm:$0xff]  }
   0x4   :  { %922 = vmatprep.subr.bf16.mxu0 %v1011_v2  ;;  %v1016_v7 = vld [vmem:[%s1492_s3 + $0x18] sm:$0xff]   ;;  %v1018_v9 = vld [vmem:[%s1492_s3 + $0x20] sm:$0xff]   ;;  %v43_v11 = vld [vmem:[%s1493_s0 + $0x8] sm:$0xff] }
   0x5   :  { %v45_v12 = vunpack.c.l.s8.bf16 %v43_v11  ;;  %v1025_v13 = vld [vmem:[%s1494_s5 + $0x4] ss:$8 sps:$4 sm:$0xff]   ;;  %v1027_v14 = vld [vmem:[%s1494_s5] ss:$8 sps:$4 sm:$0xff]   ;;  %v1028_v15 = vld [vmem:[%s1494_s5 + $0x14] ss:$8 sps:$4 sm:$0xff]   ;;  %v47_v30 = vunpack.c.h.s8.bf16 %v43_v11 }
   0x6   :  { %v1020_v16 = vld [vmem:[%s1492_s3 + $0x28] sm:$0xff]   ;;  %v1021_v17 = vld [vmem:[%s1492_s3 + $0x70] sm:$0xff]   ;;  %354 = vmatprep.subr.bf16.mxu1 %v1025_v13  ;;  %v1023_v21 = vld [vmem:[%s1492_s3 + $0x78] sm:$0xff]  }
   0x7   :  { %923 = vmatpush3.bf16.msra.mxu0 %v1012_v3  ;;  %215 = vmatprep.mubr.bf16.mxu0 %v45_v12  ;;  %v1030_v18 = vld [vmem:[%s1494_s5 + $0x10] ss:$8 sps:$4 sm:$0xff]   ;;  %v1031_v19 = vld [vmem:[%s1494_s5 + $0x24] ss:$8 sps:$4 sm:$0xff]   ;;  %v1034_v24 = vld [vmem:[%s1494_s5 + $0x20] ss:$8 sps:$4 sm:$0xff]  }
   0x8   :  { %924 = vmatprep.subr.bf16.mxu0 %v1013_v4  ;;  %355 = vmatpush1.bf16.msra.mxu1 %v1027_v14  ;;  %v1022_v20 = vld [vmem:[%s1492_s3 + $0x30] sm:$0xff]   ;;  %v1024_v22 = vld [vmem:[%s1492_s3 + $0x38] sm:$0xff]   ;;  %v42_v23 = vld [vmem:[%s1493_s0] sm:$0xff] }
   0x9   :  { %356 = vmatprep.subr.bf16.mxu1 %v1028_v15  ;;  %v1033_v25 = vld [vmem:[%s1495_s7] sm:$0xff]   ;;  %v1035_v26 = vld [vmem:[%s1494_s5 + $0x34] ss:$8 sps:$4 sm:$0xff]   ;;  %v1038_v27 = vld [vmem:[%s1494_s5 + $0x30] ss:$8 sps:$4 sm:$0xff]   ;;  %v44_v29 = vunpack.c.l.s8.bf16 %v42_v23  ;;  %v46_v34 = vunpack.c.h.s8.bf16 %v42_v23 }
   0xa   :  { %v1039_v28 = vld [vmem:[%s1494_s5 + $0x44] ss:$8 sps:$4 sm:$0xff]   ;;  %v1042_v32 = vld [vmem:[%s1494_s5 + $0x40] ss:$8 sps:$4 sm:$0xff]   ;;  %v1041_v33 = vld [vmem:[%s1495_s7 + $0x10] sm:$0xff]  }
   0xb   :  { %925 = vmatpush3.bf16.msra.mxu0 %v1014_v5  ;;  %v1037_v31 = vld [vmem:[%s1495_s7 + $0x8] sm:$0xff]   ;;  %v1043_v35 = vld [vmem:[%s1494_s5 + $0x54] ss:$8 sps:$4 sm:$0xff]   ;;  %v1046_v37 = vld [vmem:[%s1494_s5 + $0x50] ss:$8 sps:$4 sm:$0xff]  }
   0xc   :  { %926 = vmatprep.subr.bf16.mxu0 %v1015_v6  ;;  %357 = vmatpush1.bf16.msra.mxu1 %v1030_v18  ;;  %v1045_v36 = vld [vmem:[%s1495_s7 + $0x18] sm:$0xff]   ;;  %v1047_v38 = vld [vmem:[%s1494_s5 + $0x64] ss:$8 sps:$4 sm:$0xff]   ;;  %v1050_v40 = vld [vmem:[%s1494_s5 + $0x60] ss:$8 sps:$4 sm:$0xff]  }
   0xd   :  { %358 = vmatprep.subr.bf16.mxu1 %v1031_v19  ;;  %v1049_v39 = vld [vmem:[%s1495_s7 + $0x20] sm:$0xff]   ;;  %v1051_v41 = vld [vmem:[%s1494_s5 + $0x74] ss:$8 sps:$4 sm:$0xff]   ;;  %v1053_v42 = vld [vmem:[%s1495_s7 + $0x28] sm:$0xff]  }
   0xe   :  { %v1054_v43 = vld [vmem:[%s1494_s5 + $0x70] ss:$8 sps:$4 sm:$0xff]   ;;  %v1057_v47 = vld [vmem:[%s1496_s9] sm:$0xff]   ;;  %v919_v0 = vld [vmem:[%s1497_s2 + $0x8] sm:$0xff]  }
   0xf   :  { %927 = vmatpush3.bf16.msra.mxu0 %v1016_v7  ;;  %v1055_v44 = vld [vmem:[%s1495_s7 + $0x30] sm:$0xff]   ;;  %v1056_v46 = vld [vmem:[%s1495_s7 + $0x38] sm:$0xff]   ;;  %v852_v49 = vld [vmem:[%s1498_s4] ss:$0 sm:$0xff]  ;;  %v917_v7 = vunpack.c.l.bf16 %v919_v0 }
  0x10   :  { %928 = vmatprep.subr.bf16.mxu0 %v1017_v8  ;;  %359 = vmatpush1.bf16.msra.mxu1 %v1034_v24  ;;  %v912_v51 = vld [vmem:[%s1497_s2] sm:$0xff]   ;;  %v1058_v4 = vld [vmem:[%s1496_s9 + $0x8] sm:$0xff]   ;;  %v1059_v11 = vld [vmem:[%s1496_s9 + $0x10] sm:$0xff]  }
  0x11   :  { %360 = vmatprep.subr.bf16.mxu1 %v1035_v26  ;;  %v913_v56 = vunpack.c.l.bf16 %v912_v51  ;;  %v914_v58 = vunpack.c.h.bf16 %v912_v51  ;;  %v1060_v15 = vld [vmem:[%s1496_s9 + $0x18] sm:$0xff]   ;;  %v1063_v18 = vld [vmem:[%s1496_s9 + $0x30] sm:$0xff]   ;;  %v262_v23 = vld [vmem:[%s1499_s6] sm:$0x3] }
  0x12   :  { %v1064_v19 = vld [vmem:[%s1496_s9 + $0x38] sm:$0xff]  }
  0x13   :  { %929 = vmatpush3.bf16.msra.mxu0 %v1018_v9  ;;  %v918_v9 = vunpack.c.h.bf16 %v919_v0 }
  0x14   :  { %930 = vmatprep.subr.bf16.mxu0 %v1019_v10  ;;  %361 = vmatpush1.bf16.msra.mxu1 %v1038_v27 }
  0x15   :  { %362 = vmatprep.subr.bf16.mxu1 %v1039_v28 }
  0x17   :  { %931 = vmatpush3.bf16.msra.mxu0 %v1020_v16  ;;  %v1061_v16 = vld [vmem:[%s1496_s9 + $0x20] sm:$0xff]  }
  0x18   :  { %932 = vmatprep.subr.bf16.mxu0 %v1021_v17  ;;  %363 = vmatpush1.bf16.msra.mxu1 %v1042_v32  ;;  %v1062_v17 = vld [vmem:[%s1496_s9 + $0x28] sm:$0xff]  }
  0x19   :  { %364 = vmatprep.subr.bf16.mxu1 %v1043_v35 }
  0x1b   :  { %933 = vmatpush3.bf16.msra.mxu0 %v1022_v20  ;;  %v264_v20 = vlaneseq }
  0x1c   :  { %934 = vmatprep.subr.bf16.mxu0 %v1023_v21  ;;  %365 = vmatpush1.bf16.msra.mxu1 %v1046_v37 }
  0x1d   :  { %366 = vmatprep.subr.bf16.mxu1 %v1047_v38  ;;  %v265_v21 = vshrl.u32 %v264_v20, 7 }
  0x1f   :  { %935 = vmatpush3.bf16.msra.mxu0 %v1024_v22  ;;  %v266_v22 = vsub.s32 0, %v265_v21  ;;  %v270_v24 = vsub.s32 1, %v265_v21 }
  0x20   :  { %968 = vmatprep.subr.bf16.mxu0 %v1033_v25  ;;  %367 = vmatpush1.bf16.msra.mxu1 %v1050_v40 }
  0x21   :  { %368 = vmatprep.subr.bf16.mxu1 %v1051_v41  ;;  %v271_v26 = vrot.slane %v262_v23, %v270_v24 }
  0x22   :  { %216 = vmatmul.mubr.bf16.vlgmr.msra.gmra.mrb[0].mxu0 %v44_v29 }
  0x23   :  { %223 = vmatprep.mubr.bf16.mxu0 %v47_v30  ;;  %969 = vmatpush3.bf16.msra.mxu0 %v1033_v25  ;;  %v267_v25 = vrot.slane %v262_v23, %v266_v22 }
  0x24   :  { %970 = vmatprep.subr.bf16.mxu0 %v1037_v31  ;;  %369 = vmatpush1.bf16.msra.mxu1 %v1054_v43  ;;  %v889_v43 = vld [vmem:[%s1500_s8] ss:$0 sm:$0xff] }
  0x25   :  { %988 = vmatprep.subr.bf16.mxu1 %v1057_v47 }
  0x27   :  { %971 = vmatpush3.bf16.msra.mxu0 %v1037_v31 }
  0x28   :  { %972 = vmatprep.subr.bf16.mxu0 %v1041_v33 }
  0x2a   :  { %224 = vmatmul.mubr.bf16.gmra.mrb[4].mxu0 %v46_v34 }
  0x2b   :  { %973 = vmatpush3.bf16.msra.mxu0 %v1041_v33 }
  0x2c   :  { %974 = vmatprep.subr.bf16.mxu0 %v1045_v36 }
  0x2f   :  { %975 = vmatpush3.bf16.msra.mxu0 %v1045_v36 }
  0x30   :  { %976 = vmatprep.subr.bf16.mxu0 %v1049_v39 }
  0x33   :  { %977 = vmatpush3.bf16.msra.mxu0 %v1049_v39 }
  0x34   :  { %978 = vmatprep.subr.bf16.mxu0 %v1053_v42 }
  0x37   :  { %979 = vmatpush3.bf16.msra.mxu0 %v1053_v42 }
  0x38   :  { %980 = vmatprep.subr.bf16.mxu0 %v1055_v44 }
  0x3b   :  { %981 = vmatpush3.bf16.msra.mxu0 %v1055_v44 }
  0x3c   :  { %982 = vmatprep.subr.bf16.mxu0 %v1056_v46 }
  0x3f   :  { %983 = vmatpush3.bf16.msra.mxu0 %v1056_v46 }
  0xf5   :  { %v936_v48 = vpop.f32.mrb[0].mxu0 }
  0xf6   :  { %v937_v50 = vpop.f32.mrb[1].mxu0 }
  0xf7   :  { %v938_v52 = vadd.f32 %v937_v50, %v936_v48  ;;  %v939_v53 = vpop.f32.mrb[2].mxu0 }
  0xf8   :  { %v940_v54 = vpop.f32.mrb[3].mxu0 }
  0xf9   :  { %v218_v55 = vadd.f32 %v938_v52, %v852_v49  ;;  %v941_v57 = vadd.f32 %v940_v54, %v939_v53 }
  0xfb   :  { %v221_v59 = vadd.f32 %v941_v57, %v852_v49  ;;  %v240_v60 = vadd.f32 %v913_v56, %v218_v55 }
  0xfd   :  { %v241_v61 = vadd.f32 %v914_v58, %v221_v59  ;;  %v942_v62 = vpop.f32.mrb[4].mxu0 }
  0xfe   :  { %v943_v63 = vpop.f32.mrb[5].mxu0 }
  0xff   :  { %v944_v1 = vadd.f32 %v943_v63, %v942_v62  ;;  %v945_v2 = vpop.f32.mrb[6].mxu0  ;;  %v244_v3 = vpack.c.bf16 %v241_v61, %v240_v60 }
 0x100   :  { %v946_v5 = vpop.f32.mrb[7].mxu0 }
 0x101   :  { %v226_v6 = vadd.f32 %v944_v1, %v852_v49  ;;  %v947_v8 = vadd.f32 %v946_v5, %v945_v2  ;;  %387 = vmatmul.mubr.bf16.vlgmr.msra.gmra.mrb[0].mxu1 %v244_v3  ;;  %984 = vmatprep.mubr.bf16.mxu0 %v244_v3 }
 0x102   :  { %396 = vmatprep.mubr.bf16.mxu1 %v1113_v45  ;;  %989 = vmatpush3.bf16.msra.mxu1 %v1057_v47 }
 0x103   :  { %v229_v10 = vadd.f32 %v947_v8, %v852_v49  ;;  %990 = vmatprep.subr.bf16.mxu1 %v1058_v4  ;;  %v242_v12 = vadd.f32 %v917_v7, %v226_v6 }
 0x105   :  { %v243_v13 = vadd.f32 %v918_v9, %v229_v10 }
 0x106   :  { %991 = vmatpush3.bf16.msra.mxu1 %v1058_v4  ;;  %v507_v4 = vld [vmem:[%s1501_s1] sm:$0xff] }
 0x107   :  { %v245_v14 = vpack.c.bf16 %v243_v13, %v242_v12  ;;  %992 = vmatprep.subr.bf16.mxu1 %v1059_v11  ;;  %v509_v20 = vunpack.c.0.s8 %v507_v4 }
 0x109   :  { %397 = vmatmul.mubr.bf16.gmra.mrb[4].mxu1 %v245_v14  ;;  %985 = vmatmul.mubr.bf16.vlgmr.msra.gmra.mrb[8].mxu0 %v245_v14 }
 0x10a   :  { %993 = vmatpush3.bf16.msra.mxu1 %v1059_v11 }
 0x10b   :  { %994 = vmatprep.subr.bf16.mxu1 %v1060_v15 }
 0x10e   :  { %995 = vmatpush3.bf16.msra.mxu1 %v1060_v15  ;;  %v508_v15 = vld [vmem:[%s1501_s1 + $0x8] sm:$0xff] }
 0x10f   :  { %996 = vmatprep.subr.bf16.mxu1 %v1061_v16  ;;  %v510_v24 = vunpack.c.0.s8 %v508_v15 }
 0x112   :  { %997 = vmatpush3.bf16.msra.mxu1 %v1061_v16 }
 0x113   :  { %998 = vmatprep.subr.bf16.mxu1 %v1062_v17 }
 0x116   :  { %999 = vmatpush3.bf16.msra.mxu1 %v1062_v17 }
 0x117   :  { %1000 = vmatprep.subr.bf16.mxu1 %v1063_v18 }
 0x11a   :  { %1001 = vmatpush3.bf16.msra.mxu1 %v1063_v18 }
 0x11b   :  { %1002 = vmatprep.subr.bf16.mxu1 %v1064_v19 }
 0x11e   :  { %1003 = vmatpush3.bf16.msra.mxu1 %v1064_v19 }
 0x1d4   :  { %v388_v27 = vpop.f32.mrb[0].mxu1 }
 0x1d5   :  { %v1346_v28 = vadd.f32 %v388_v27, %v267_v25  ;;  %v390_v29 = vpop.f32.mrb[1].mxu1 }
 0x1d6   :  { %v1348_v30 = vadd.f32 %v390_v29, %v271_v26  ;;  %v392_v31 = vpop.f32.mrb[2].mxu1  ;;  %v511_v29 = vunpack.c.1.s8 %v507_v4 }
 0x1d7   :  { %v407_v32 = vand.u32 2147483647, %v1346_v28  ;;  %v1351_v33 = vadd.f32 %v392_v31, %v267_v25  ;;  %v394_v34 = vpop.f32.mrb[3].mxu1  ;;  %v512_v31 = vunpack.c.1.s8 %v508_v15  ;;  %vm455_vm0 = vcmp.ge.f32.partialorder %v1346_v28, 0.0 }
 0x1d8   :  { %v408_v35 = vand.u32 2147483647, %v1348_v30  ;;  %v1354_v36 = vadd.f32 %v394_v34, %v271_v26  ;;  %v517_v34 = vcvt.s32.f32 %v509_v20  ;;  %vm456_vm1 = vcmp.ge.f32.partialorder %v1348_v30, 0.0 }
 0x1d9   :  { %v415_v37 = vsub.f32 0.0, %v407_v32  ;;  %v409_v38 = vand.u32 2147483647, %v1351_v33  ;;  %v513_v32 = vunpack.c.2.s8 %v507_v4  ;;  %vm457_vm2 = vcmp.ge.f32.partialorder %v1351_v33, 0.0 }
 0x1da   :  { %v416_v39 = vsub.f32 0.0, %v408_v35  ;;  %v410_v40 = vand.u32 2147483647, %v1354_v36  ;;  %vm458_vm3 = vcmp.ge.f32.partialorder %v1354_v36, 0.0 }
 0x1db   :  { %v423_v41 = vmul.f32 1.442695, %v415_v37  ;;  %v417_v42 = vsub.f32 0.0, %v409_v38  ;;  %v514_v37 = vunpack.c.2.s8 %v508_v15  ;;  %v518_v38 = vcvt.s32.f32 %v510_v24 }
 0x1dc   :  { %v425_v44 = vmul.f32 1.442695, %v416_v39  ;;  %v418_v45 = vsub.f32 0.0, %v410_v40  ;;  %v398_v46 = vpop.f32.mrb[4].mxu1  ;;  %v986_v47 = vpop.f32.mrb[8].mxu0  ;;  %v515_v40 = vunpack.c.3.s8 %v507_v4 }
 0x1dd   :  { %1065 = vpow2.f32 %v423_v41  ;;  %v427_v48 = vmul.f32 1.442695, %v417_v42  ;;  %v1361_v49 = vadd.f32 %v398_v46, %v267_v25  ;;  %v400_v50 = vpop.f32.mrb[5].mxu1  ;;  %v695_v51 = vpop.f32.mrb[9].mxu0  ;;  %v704_v57 = vadd.f32 %v986_v47, %v889_v43 }
 0x1de   :  { %1067 = vpow2.f32 %v425_v44  ;;  %v429_v52 = vmul.f32 1.442695, %v418_v45  ;;  %v1363_v53 = vadd.f32 %v400_v50, %v271_v26  ;;  %v402_v54 = vpop.f32.mrb[6].mxu1  ;;  %v987_v55 = vpop.f32.mrb[10].mxu0  ;;  %v696_v61 = vadd.f32 %v889_v43, %v695_v51 }
 0x1df   :  { %1069 = vpow2.f32 %v427_v48  ;;  %v411_v56 = vand.u32 2147483647, %v1361_v49  ;;  %v404_v58 = vpop.f32.mrb[7].mxu1  ;;  %v698_v59 = vpop.f32.mrb[11].mxu0  ;;  %v1367_v63 = vadd.f32 %v402_v54, %v267_v25  ;;  %v707_v0 = vadd.f32 %v987_v55, %v889_v43 }
 0x1e0   :  { %1071 = vpow2.f32 %v429_v52  ;;  %v412_v60 = vand.u32 2147483647, %v1363_v53  ;;  %v1369_v1 = vadd.f32 %v404_v58, %v271_v26  ;;  %v699_v3 = vadd.f32 %v889_v43, %v698_v59 }
 0x1e1   :  { %v419_v62 = vsub.f32 0.0, %v411_v56  ;;  %v712_v6 = vmax.f32 %v704_v57, 0.0  ;;  %v413_v7 = vand.u32 2147483647, %v1367_v63  ;;  %v713_v8 = vmax.f32 %v707_v0, 0.0 }
 0x1e2   :  { %v420_v2 = vsub.f32 0.0, %v412_v60  ;;  %v710_v10 = vmax.f32 %v696_v61, 0.0  ;;  %v414_v11 = vand.u32 2147483647, %v1369_v1  ;;  %v711_v12 = vmax.f32 %v699_v3, 0.0 }
 0x1e3   :  { %v431_v5 = vmul.f32 1.442695, %v419_v62  ;;  %v421_v13 = vsub.f32 0.0, %v413_v7  ;;  %v715_v14 = vpack.c.bf16 %v713_v8, %v712_v6  ;;  %v516_v41 = vunpack.c.3.s8 %v508_v15 }
 0x1e4   :  { %v433_v9 = vmul.f32 1.442695, %v420_v2  ;;  %v422_v16 = vsub.f32 0.0, %v414_v11  ;;  %v714_v17 = vpack.c.bf16 %v711_v12, %v710_v10  ;;  %v519_v42 = vcvt.s32.f32 %v511_v29 }
 0x1e5   :  { %1073 = vpow2.f32 %v431_v5  ;;  %v435_v19 = vmul.f32 1.442695, %v421_v13  ;;  %v520_v43 = vcvt.s32.f32 %v512_v31  ;;  %v521_v44 = vcvt.s32.f32 %v513_v32 }
 0x1e6   :  { %1075 = vpow2.f32 %v433_v9  ;;  %v437_v22 = vmul.f32 1.442695, %v422_v16  ;;  %1004 = vmatprep.mubr.bf16.mxu1 %v714_v17  ;;  %v525_v46 = vmax.f32 %v1346_v28, 0.0  ;;  %v533_v47 = vmul.f32 %v517_v34, %v1346_v28 }
 0x1e7   :  { %v1379_v18 = vpop.eup %1065  ;;  %1077 = vpow2.f32 %v435_v19  ;;  %1005 = vmatmul.mubr.bf16.vlgmr.msra.gmra.mrb[8].mxu1 %v715_v14  ;;  %v522_v48 = vcvt.s32.f32 %v514_v37  ;;  %v526_v51 = vmax.f32 %v1348_v30, 0.0  ;;  %v534_v52 = vmul.f32 %v518_v38, %v1348_v30 }
 0x1e8   :  { %v1068_v21 = vpop.eup %1067  ;;  %v439_v23 = vadd.f32 1.0, %v1379_v18  ;;  %1079 = vpow2.f32 %v437_v22  ;;  %v1398_v56 = vcvt.s32.f32 %v515_v40  ;;  %v1400_v57 = vcvt.s32.f32 %v516_v41 }
 0x1e9   :  { %v1382_v25 = vpop.eup %1069  ;;  %v440_v26 = vadd.f32 1.0, %v1068_v21  ;;  %v541_v59 = vsub.f32 %v525_v46, %v533_v47  ;;  %v527_v60 = vmax.f32 %v1351_v33, 0.0  ;;  %v542_v62 = vsub.f32 %v526_v51, %v534_v52 }
 0x1ea   :  { %v1384_v27 = vpop.eup %1071  ;;  %v441_v35 = vadd.f32 1.0, %v1382_v25  ;;  %v528_v0 = vmax.f32 %v1354_v36, 0.0  ;;  %v535_v4 = vmul.f32 %v519_v42, %v1351_v33  ;;  %v536_v5 = vmul.f32 %v520_v43, %v1354_v36 }
 0x1eb   :  { %1081 = vrcp.f32 %v440_v26  ;;  %v442_v39 = vadd.f32 1.0, %v1384_v27  ;;  %v464_v8 = vsel %vm456_vm1, 1.0, %v1068_v21  ;;  %v529_v9 = vmax.f32 %v1361_v49, 0.0 }
 0x1ec   :  { %1083 = vlog2.f32 %v439_v23  ;;  %v530_v10 = vmax.f32 %v1363_v53, 0.0  ;;  %vm459_vm4 = vcmp.ge.f32.partialorder %v1361_v49, 0.0  ;;  %v537_v14 = vmul.f32 %v521_v44, %v1361_v49 }
 0x1ed   :  { %1085 = vlog2.f32 %v440_v26  ;;  %v463_v16 = vsel %vm455_vm0, 1.0, %v1379_v18  ;;  %v538_v17 = vmul.f32 %v522_v48, %v1363_v53  ;;  %v465_v20 = vsel %vm457_vm2, 1.0, %v1382_v25 }
 0x1ee   :  { %1087 = vrcp.f32 %v439_v23  ;;  %v466_v24 = vsel %vm458_vm3, 1.0, %v1384_v27  ;;  %vm460_vm5 = vcmp.ge.f32.partialorder %v1363_v53, 0.0  ;;  %vm461_vm6 = vcmp.ge.f32.partialorder %v1367_v63, 0.0 }
 0x1ef   :  { %v1388_v45 = vpop.eup %1073  ;;  %1089 = vrcp.f32 %v441_v35  ;;  %vm462_vm7 = vcmp.ge.f32.partialorder %v1369_v1, 0.0  ;;  %v543_v32 = vsub.f32 %v527_v60, %v535_v4  ;;  %v544_v27 = vsub.f32 %v528_v0, %v536_v5 }
 0x1f0   :  { %v1392_v50 = vpop.eup %1075  ;;  %1091 = vrcp.f32 %v442_v39  ;;  %v443_v54 = vadd.f32 1.0, %v1388_v45  ;;  %v545_v38 = vsub.f32 %v529_v9, %v537_v14  ;;  %v546_v42 = vsub.f32 %v530_v10, %v538_v17 }
 0x1f1   :  { %1093 = vlog2.f32 %v441_v35  ;;  %v444_v55 = vadd.f32 1.0, %v1392_v50  ;;  %v1405_v58 = vpop.eup %1077  ;;  %v468_v40 = vsel %vm460_vm5, 1.0, %v1392_v50  ;;  %v531_v43 = vmax.f32 %v1367_v63, 0.0 }
 0x1f2   :  { %1095 = vlog2.f32 %v442_v39  ;;  %v1409_v61 = vpop.eup %1079  ;;  %v445_v2 = vadd.f32 1.0, %v1405_v58  ;;  %v532_v51 = vmax.f32 %v1369_v1, 0.0  ;;  %v467_v53 = vsel %vm459_vm4, 1.0, %v1388_v45 }
 0x1f3   :  { %1097 = vrcp.f32 %v444_v55  ;;  %v446_v6 = vadd.f32 1.0, %v1409_v61  ;;  %v469_v60 = vsel %vm461_vm6, 1.0, %v1405_v58  ;;  %v470_v49 = vsel %vm462_vm7, 1.0, %v1409_v61 }
 0x1f4   :  { %1099 = vlog2.f32 %v443_v54 }
 0x1f5   :  { %v1082_v3 = vpop.eup %1081  ;;  %1101 = vlog2.f32 %v444_v55  ;;  %v540_v55 = vmul.f32 %v1400_v57, %v1369_v1 }
 0x1f6   :  { %v1084_v7 = vpop.eup %1083  ;;  %1103 = vrcp.f32 %v443_v54  ;;  %v472_v12 = vmul.f32 %v1082_v3, %v464_v8  ;;  %v539_v54 = vmul.f32 %v1398_v56, %v1367_v63 }
 0x1f7   :  { %v1086_v11 = vpop.eup %1085  ;;  %v550_v13 = vmul.f32 0.6931472, %v1084_v7  ;;  %1105 = vrcp.f32 %v445_v2  ;;  %v548_v58 = vsub.f32 %v532_v51, %v540_v55 }
 0x1f8   :  { %v1088_v15 = vpop.eup %1087  ;;  %v552_v30 = vmul.f32 0.6931472, %v1086_v11  ;;  %1107 = vrcp.f32 %v446_v6  ;;  %v547_v8 = vsub.f32 %v531_v43, %v539_v54 }
 0x1f9   :  { %v1090_v19 = vpop.eup %1089  ;;  %v565_v21 = vadd.f32 %v550_v13, %v541_v59  ;;  %v471_v22 = vmul.f32 %v1088_v15, %v463_v16  ;;  %1109 = vlog2.f32 %v445_v2  ;;  %v898_v16 = vld [vmem:[%s1504_s10] ss:$0 sm:$0xff] }
 0x1fa   :  { %v1092_v23 = vpop.eup %1091  ;;  %v566_v26 = vadd.f32 %v552_v30, %v542_v62  ;;  %v473_v28 = vmul.f32 %v1090_v19, %v465_v20  ;;  %1111 = vlog2.f32 %v446_v6 }
 0x1fb   :  { %v1094_v18 = vpop.eup %1093  ;;  %v907_v29 = vpack.c.bf16 %v472_v12, %v471_v22  ;;  %v474_v31 = vmul.f32 %v1092_v23, %v466_v24 }
 0x1fc   :  { %v1096_v33 = vpop.eup %1095  ;;  %v573_v25 = vadd.f32 %v566_v26, %v565_v21  ;;  %v554_v34 = vmul.f32 0.6931472, %v1094_v18 }
 0x1fd   :  { %v1098_v35 = vpop.eup %1097  ;;  %503 = vst [vmem:[%s1502_s11] sm:$0xff] %v907_v29  ;;  %v908_v36 = vpack.c.bf16 %v474_v31, %v473_v28  ;;  %v556_v37 = vmul.f32 0.6931472, %v1096_v33 }
 0x1fe   :  { %v1100_v39 = vpop.eup %1099  ;;  %574 = vadd.xlane.f32.xlu0 %v573_v25  ;;  %v567_v41 = vadd.f32 %v554_v34, %v543_v32  ;;  %v476_v47 = vmul.f32 %v1098_v35, %v468_v40 }
 0x1ff   :  { %v1102_v44 = vpop.eup %1101  ;;  %504 = vst [vmem:[%s1502_s11 + $0x8] sm:$0xff] %v908_v36  ;;  %v568_v46 = vadd.f32 %v556_v37, %v544_v27  ;;  %v558_v48 = vmul.f32 0.6931472, %v1100_v39 }
 0x200   :  { %v1104_v52 = vpop.eup %1103  ;;  %v560_v50 = vmul.f32 0.6931472, %v1102_v44 }
 0x201   :  { %v1106_v59 = vpop.eup %1105  ;;  %v576_v62 = vadd.f32 %v568_v46, %v567_v41  ;;  %v569_v0 = vadd.f32 %v558_v48, %v545_v38  ;;  %v475_v2 = vmul.f32 %v1104_v52, %v467_v53 }
 0x202   :  { %v1108_v3 = vpop.eup %1107  ;;  %v570_v45 = vadd.f32 %v560_v50, %v546_v42  ;;  %v477_v4 = vmul.f32 %v1106_v59, %v469_v60 }
 0x203   :  { %v1110_v5 = vpop.eup %1109  ;;  %577 = vadd.xlane.f32.xlu0 %v576_v62  ;;  %v909_v56 = vpack.c.bf16 %v476_v47, %v475_v2  ;;  %v478_v6 = vmul.f32 %v1108_v3, %v470_v49 }
 0x204   :  { %v1112_v57 = vpop.eup %1111  ;;  %v579_v7 = vadd.f32 %v570_v45, %v569_v0  ;;  %v562_v9 = vmul.f32 0.6931472, %v1110_v5 }
 0x205   :  { %505 = vst [vmem:[%s1502_s11 + $0x10] sm:$0xff] %v909_v56  ;;  %v910_v63 = vpack.c.bf16 %v478_v6, %v477_v4  ;;  %v564_v10 = vmul.f32 0.6931472, %v1112_v57 }
 0x206   :  { %580 = vadd.xlane.f32.xlu1 %v579_v7  ;;  %v571_v1 = vadd.f32 %v562_v9, %v547_v8 }
 0x207   :  { %506 = vst [vmem:[%s1502_s11 + $0x18] sm:$0xff] %v910_v63  ;;  %v572_v61 = vadd.f32 %v564_v10, %v548_v58 }
 0x209   :  { %v582_v11 = vadd.f32 %v572_v61, %v571_v1 }
 0x20b   :  { %583 = vadd.xlane.f32.xlu1 %v582_v11 }
 0x28b   :  { %v575_v12 = vpop.xlane.xlu0 %574 }
 0x28c   :  { %586 = vst.msk [vmem:[%s1503_s12] sm:$0xff] %vm585_vm8, %v575_v12 }
 0x290   :  { %v578_v13 = vpop.xlane.xlu0 %577 }
 0x291   :  { %587 = vst.msk [vmem:[%s1503_s12 + $0x8] sm:$0xff] %vm585_vm8, %v578_v13 }
 0x293   :  { %v581_v14 = vpop.xlane.xlu1 %580 }
 0x294   :  { %588 = vst.msk [vmem:[%s1503_s12 + $0x10] sm:$0xff] %vm585_vm8, %v581_v14 }
 0x298   :  { %v584_v15 = vpop.xlane.xlu1 %583 }
 0x299   :  { %589 = vst.msk [vmem:[%s1503_s12 + $0x18] sm:$0xff] %vm585_vm8, %v584_v15 }
 0x2ba   :  { %v1006_v30 = vpop.f32.mrb[8].mxu1 }
 0x2bb   :  { %v830_v17 = vadd.f32 %v1006_v30, %v898_v16  ;;  %v821_v19 = vpop.f32.mrb[9].mxu1 }
 0x2bc   :  { %v822_v20 = vadd.f32 %v898_v16, %v821_v19  ;;  %v1007_v21 = vpop.f32.mrb[10].mxu1 }
 0x2bd   :  { %838 = vst [vmem:[%s1505_s13 + $0x10] sm:$0xff] %v830_v17  ;;  %v833_v22 = vadd.f32 %v1007_v21, %v898_v16  ;;  %v824_v23 = vpop.f32.mrb[11].mxu1 }
 0x2be   :  { %836 = vst [vmem:[%s1505_s13] sm:$0xff] %v822_v20  ;;  %v825_v24 = vadd.f32 %v898_v16, %v824_v23 }
 0x2bf   :  { %839 = vst [vmem:[%s1505_s13 + $0x18] sm:$0xff] %v833_v22 }
 0x2c0   :  { %837 = vst [vmem:[%s1505_s13 + $0x8] sm:$0xff] %v825_v24 }

</bundles_post_ra>
